<compile_context>
chip_gen: v5e
topology: v5e:2x2
jax: 0.10.0
libtpu: 0.0.40
codegen_flags: <defaults>
</compile_context>

<pallas_src>
import jax
import jax.numpy as jnp
from jax.experimental import pallas as pl
from jax.experimental.pallas import tpu as pltpu

HIDDEN_PAD = 128   # hidden width padded to a full 128-lane / 16-sublane tile
MAX_TILE_B = 512   # cap on the batch tile (VMEM use is tiny at this size)


def _mlp_kernel(x_ref, w1_ref, b1_ref, w2_ref, b2_ref, w3_ref, b3_ref, o_ref):
    # Hoisted single bias loads (broadcast over the batch tile; no inner loops).
    b1 = b1_ref[...]
    b2 = b2_ref[...]
    b3 = b3_ref[...]

    # In-kernel f32 -> bf16 cast of the streaming activations (free under MXU).
    x = x_ref[...].astype(jnp.bfloat16)

    # fc1 + ReLU  (bf16 operands, f32 MXU accumulation)
    h1 = jnp.dot(x, w1_ref[...], preferred_element_type=jnp.float32)
    h1 = jnp.maximum(h1 + b1, 0.0)

    # fc2 + ReLU
    h2 = jnp.dot(h1.astype(jnp.bfloat16), w2_ref[...],
                 preferred_element_type=jnp.float32)
    h2 = jnp.maximum(h2 + b2, 0.0)

    # fc3 (logits, no activation) -> narrow f32 store (nr_classes lanes)
    out = jnp.dot(h2.astype(jnp.bfloat16), w3_ref[...],
                  preferred_element_type=jnp.float32)
    o_ref[...] = (out + b3).astype(o_ref.dtype)


def prepare_params(w1_t, b1, w2_t, b2, w3_t, b3):
    """One-time weight prep (do NOT call per forward pass).

    w*_t: [in, out] (transposed PyTorch weight), b*: [out] or [1, out].
    Returns padded bf16 weights and f32 biases ready for the kernel.  All
    padding is zeros, so the math is identical to the unpadded module.
    """
    input_size, hidden = w1_t.shape
    nr_classes = w3_t.shape[1]
    hp = max(HIDDEN_PAD, ((hidden + 15) // 16) * 16)  # bf16 sublane tile = 16

    def pad2(a, rows, cols):
        return jnp.pad(a, ((0, rows - a.shape[0]), (0, cols - a.shape[1])))

    w1_p = pad2(w1_t, input_size, hp).astype(jnp.bfloat16)
    w2_p = pad2(w2_t, hp, hp).astype(jnp.bfloat16)
    w3_p = pad2(w3_t, hp, nr_classes).astype(jnp.bfloat16)
    b1_p = pad2(jnp.asarray(b1).reshape(1, -1), 1, hp).astype(jnp.float32)
    b2_p = pad2(jnp.asarray(b2).reshape(1, -1), 1, hp).astype(jnp.float32)
    b3_p = jnp.asarray(b3).reshape(1, -1).astype(jnp.float32)
    return (w1_p, b1_p, w2_p, b2_p, w3_p, b3_p)


def _choose_tile_b(batch):
    # Aim for >=2 grid steps (v7x 2-TC sharding + DMA/compute overlap) while
    # avoiding batch padding at the default B=64; cap the tile at 512 rows.
    half = -(-batch // 2)                     # ceil(batch / 2)
    tile = ((half + 15) // 16) * 16           # round up to 16 rows
    return max(16, min(MAX_TILE_B, tile))


def nn_classifier_forward(x, params):
    """x: [B, input_size] f32.  params: output of prepare_params()."""
    w1_p, b1_p, w2_p, b2_p, w3_p, b3_p = params
    batch, input_size = x.shape
    hp = w1_p.shape[1]
    nr_classes = w3_p.shape[1]

    tile_b = _choose_tile_b(batch)
    bp = ((batch + tile_b - 1) // tile_b) * tile_b
    x_p = x if bp == batch else jnp.pad(x, ((0, bp - batch), (0, 0)))

    grid = (bp // tile_b,)
    resident = lambda a: pl.BlockSpec(a.shape, lambda i: (0,) * a.ndim)

    flops = 2 * bp * (input_size * hp + hp * hp + hp * nr_classes)
    bytes_accessed = (
        x_p.size * 4
        + (w1_p.size + w2_p.size + w3_p.size) * 2
        + (b1_p.size + b2_p.size + b3_p.size) * 4
        + bp * nr_classes * 4
    )

    out = pl.pallas_call(
        _mlp_kernel,
        out_shape=jax.ShapeDtypeStruct((bp, nr_classes), jnp.float32),
        grid_spec=pltpu.PrefetchScalarGridSpec(
            num_scalar_prefetch=0,
            grid=grid,
            in_specs=[
                pl.BlockSpec((tile_b, input_size), lambda i: (i, 0)),  # x streams
                resident(w1_p), resident(b1_p),
                resident(w2_p), resident(b2_p),
                resident(w3_p), resident(b3_p),
            ],
            out_specs=pl.BlockSpec((tile_b, nr_classes), lambda i: (i, 0)),
        ),
        compiler_params=pltpu.CompilerParams(
            dimension_semantics=("parallel",)),
        cost_estimate=pl.CostEstimate(
            flops=flops, transcendentals=0, bytes_accessed=bytes_accessed),
    )(x_p, w1_p, b1_p, w2_p, b2_p, w3_p, b3_p)

    return out if bp == batch else out[:batch]


def _init_linear(key, fan_in, fan_out):
    """Deterministic init mimicking torch.nn.Linear default (uniform +/- 1/sqrt(fan_in)).
    Returns (W_t [fan_in, fan_out], b [1, fan_out])."""
    kw, kb = jax.random.split(key)
    bound = 1.0 / jnp.sqrt(jnp.float32(fan_in))
    w_t = jax.random.uniform(kw, (fan_in, fan_out), jnp.float32, -bound, bound)
    b = jax.random.uniform(kb, (1, fan_out), jnp.float32, -bound, bound)
    return w_t, b


def _reference_bf16(x, w1_t, b1, w2_t, b2, w3_t, b3):
    """Pure-JAX reference using the same bf16-operand / f32-accumulate path."""
    xb = x.astype(jnp.bfloat16)
    w1b = w1_t.astype(jnp.bfloat16)
    w2b = w2_t.astype(jnp.bfloat16)
    w3b = w3_t.astype(jnp.bfloat16)
    h1 = jnp.maximum(jnp.dot(xb, w1b, preferred_element_type=jnp.float32) + b1, 0.0)
    h2 = jnp.maximum(
        jnp.dot(h1.astype(jnp.bfloat16), w2b, preferred_element_type=jnp.float32) + b2, 0.0)
    return jnp.dot(h2.astype(jnp.bfloat16), w3b, preferred_element_type=jnp.float32) + b3


if __name__ == "__main__":
    # Module-consistent small shapes: input_size = 16 data columns,
    # nr_classes = 8, batch = 64 (the module's default batch size).
    batch, input_size, hidden, nr_classes = 64, 16, 50, 8

    key = jax.random.PRNGKey(0)
    kx, k1, k2, k3 = jax.random.split(key, 4)

    x = jax.random.normal(kx, (batch, input_size), jnp.float32)
    w1_t, b1 = _init_linear(k1, input_size, hidden)
    w2_t, b2 = _init_linear(k2, hidden, hidden)
    w3_t, b3 = _init_linear(k3, hidden, nr_classes)

    # One-time weight prep (hoisted out of the forward path).
    params = jax.tree_util.tree_map(jax.block_until_ready,
                                    prepare_params(w1_t, b1, w2_t, b2, w3_t, b3))

    fwd = jax.jit(nn_classifier_forward)
    out = jax.block_until_ready(fwd(x, params))
    assert out.shape == (batch, nr_classes)

    # Check 1: tight match vs the identical bf16-operand / f32-accumulate reference.
    ref_mixed = _reference_bf16(x, w1_t, b1, w2_t, b2, w3_t, b3)
    assert jnp.allclose(out, ref_mixed, atol=1e-3, rtol=1e-3), "mismatch vs bf16 reference"

    # Check 2: close to the module's full-f32 forward (loose tolerance covers bf16 casts).
    ref_f32 = jnp.maximum(x @ w1_t + b1, 0.0)
    ref_f32 = jnp.maximum(ref_f32 @ w2_t + b2, 0.0)
    ref_f32 = ref_f32 @ w3_t + b3
    assert jnp.allclose(out, ref_f32, atol=5e-2, rtol=5e-2), "mismatch vs f32 reference"

    print("KERNEL_OK")
</pallas_src>

<mosaic_0001>
module attributes {stable_mosaic.version = 11 : i64} {
  func.func @_mlp_kernel(%arg0: i32, %arg1: memref<32x16xf32, #tpu.memory_space<vmem>>, %arg2: memref<16x128xbf16, #tpu.memory_space<vmem>>, %arg3: memref<1x128xf32, #tpu.memory_space<vmem>>, %arg4: memref<128x128xbf16, #tpu.memory_space<vmem>>, %arg5: memref<1x128xf32, #tpu.memory_space<vmem>>, %arg6: memref<128x8xbf16, #tpu.memory_space<vmem>>, %arg7: memref<1x8xf32, #tpu.memory_space<vmem>>, %arg8: memref<32x8xf32, #tpu.memory_space<vmem>>) attributes {dimension_semantics = [#tpu.dimension_semantics<parallel>], iteration_bounds = array<i64: 2>, scalar_prefetch = 0 : i64, scratch_operands = 0 : i64, tpu.core_type = #tpu.core_type<tc>, window_params = [{transform_indices = @transform_0, window_bounds = array<i64: 32, 16>}, {pipeline_mode = #tpu.pipeline_mode<synchronous>, transform_indices = @transform_1, window_bounds = array<i64: 16, 128>}, {pipeline_mode = #tpu.pipeline_mode<synchronous>, transform_indices = @transform_2, window_bounds = array<i64: 1, 128>}, {pipeline_mode = #tpu.pipeline_mode<synchronous>, transform_indices = @transform_3, window_bounds = array<i64: 128, 128>}, {pipeline_mode = #tpu.pipeline_mode<synchronous>, transform_indices = @transform_4, window_bounds = array<i64: 1, 128>}, {pipeline_mode = #tpu.pipeline_mode<synchronous>, transform_indices = @transform_5, window_bounds = array<i64: 128, 8>}, {pipeline_mode = #tpu.pipeline_mode<synchronous>, transform_indices = @transform_6, window_bounds = array<i64: 1, 8>}, {transform_indices = @transform_7, window_bounds = array<i64: 32, 8>}]} {
    %c0 = arith.constant 0 : index
    %c0_0 = arith.constant 0 : index
    %0 = vector.load %arg3[%c0, %c0_0] : memref<1x128xf32, #tpu.memory_space<vmem>>, vector<1x128xf32>
    %c0_1 = arith.constant 0 : index
    %c0_2 = arith.constant 0 : index
    %1 = vector.load %arg5[%c0_1, %c0_2] : memref<1x128xf32, #tpu.memory_space<vmem>>, vector<1x128xf32>
    %c0_3 = arith.constant 0 : index
    %c0_4 = arith.constant 0 : index
    %2 = vector.load %arg7[%c0_3, %c0_4] : memref<1x8xf32, #tpu.memory_space<vmem>>, vector<1x8xf32>
    %c0_5 = arith.constant 0 : index
    %c0_6 = arith.constant 0 : index
    %3 = vector.load %arg1[%c0_5, %c0_6] : memref<32x16xf32, #tpu.memory_space<vmem>>, vector<32x16xf32>
    %4 = arith.truncf %3 : vector<32x16xf32> to vector<32x16xbf16>
    %c0_7 = arith.constant 0 : index
    %c0_8 = arith.constant 0 : index
    %5 = vector.load %arg2[%c0_7, %c0_8] : memref<16x128xbf16, #tpu.memory_space<vmem>>, vector<16x128xbf16>
    %cst = arith.constant dense<0.000000e+00> : vector<32x128xf32>
    %6 = tpu.matmul %4, %5, %cst {dimension_numbers = #tpu.dot_dimension_numbers<[1], [0], [0], [1], [0, 0, 1, 1], [], []>} : vector<32x16xbf16>, vector<16x128xbf16>, vector<32x128xf32> -> vector<32x128xf32>
    %7 = vector.broadcast %0 : vector<1x128xf32> to vector<32x128xf32>
    %8 = arith.addf %6, %7 : vector<32x128xf32>
    %cst_9 = arith.constant 0.000000e+00 : f32
    %9 = vector.broadcast %cst_9 : f32 to vector<32x128xf32>
    %10 = arith.maximumf %8, %9 : vector<32x128xf32>
    %11 = arith.truncf %10 : vector<32x128xf32> to vector<32x128xbf16>
    %c0_10 = arith.constant 0 : index
    %c0_11 = arith.constant 0 : index
    %12 = vector.load %arg4[%c0_10, %c0_11] : memref<128x128xbf16, #tpu.memory_space<vmem>>, vector<128x128xbf16>
    %cst_12 = arith.constant dense<0.000000e+00> : vector<32x128xf32>
    %13 = tpu.matmul %11, %12, %cst_12 {dimension_numbers = #tpu.dot_dimension_numbers<[1], [0], [0], [1], [0, 0, 1, 1], [], []>} : vector<32x128xbf16>, vector<128x128xbf16>, vector<32x128xf32> -> vector<32x128xf32>
    %14 = vector.broadcast %1 : vector<1x128xf32> to vector<32x128xf32>
    %15 = arith.addf %13, %14 : vector<32x128xf32>
    %cst_13 = arith.constant 0.000000e+00 : f32
    %16 = vector.broadcast %cst_13 : f32 to vector<32x128xf32>
    %17 = arith.maximumf %15, %16 : vector<32x128xf32>
    %18 = arith.truncf %17 : vector<32x128xf32> to vector<32x128xbf16>
    %c0_14 = arith.constant 0 : index
    %c0_15 = arith.constant 0 : index
    %19 = vector.load %arg6[%c0_14, %c0_15] : memref<128x8xbf16, #tpu.memory_space<vmem>>, vector<128x8xbf16>
    %cst_16 = arith.constant dense<0.000000e+00> : vector<32x8xf32>
    %20 = tpu.matmul %18, %19, %cst_16 {dimension_numbers = #tpu.dot_dimension_numbers<[1], [0], [0], [1], [0, 0, 1, 1], [], []>} : vector<32x128xbf16>, vector<128x8xbf16>, vector<32x8xf32> -> vector<32x8xf32>
    %21 = vector.broadcast %2 : vector<1x8xf32> to vector<32x8xf32>
    %22 = arith.addf %20, %21 : vector<32x8xf32>
    %c0_17 = arith.constant 0 : index
    %c0_18 = arith.constant 0 : index
    %23 = vector.load %arg8[%c0_17, %c0_18] : memref<32x8xf32, #tpu.memory_space<vmem>>, vector<32x8xf32>
    tpu.vector_store %arg8[%c0_17, %c0_18], %22 {strides = array<i32>} : memref<32x8xf32, #tpu.memory_space<vmem>>, vector<32x8xf32>,
    return
  }
  func.func @transform_0(%arg0: i32) -> (i32, i32) {
    %c0_i32 = arith.constant 0 : i32
    %c0_i32_0 = arith.constant 0 : i32
    return %arg0, %c0_i32 : i32, i32
  }
  func.func @transform_1(%arg0: i32) -> (i32, i32) {
    %c0_i32 = arith.constant 0 : i32
    %c0_i32_0 = arith.constant 0 : i32
    %c0_i32_1 = arith.constant 0 : i32
    return %c0_i32, %c0_i32_0 : i32, i32
  }
  func.func @transform_2(%arg0: i32) -> (i32, i32) {
    %c0_i32 = arith.constant 0 : i32
    %c0_i32_0 = arith.constant 0 : i32
    %c0_i32_1 = arith.constant 0 : i32
    return %c0_i32, %c0_i32_0 : i32, i32
  }
  func.func @transform_3(%arg0: i32) -> (i32, i32) {
    %c0_i32 = arith.constant 0 : i32
    %c0_i32_0 = arith.constant 0 : i32
    %c0_i32_1 = arith.constant 0 : i32
    return %c0_i32, %c0_i32_0 : i32, i32
  }
  func.func @transform_4(%arg0: i32) -> (i32, i32) {
    %c0_i32 = arith.constant 0 : i32
    %c0_i32_0 = arith.constant 0 : i32
    %c0_i32_1 = arith.constant 0 : i32
    return %c0_i32, %c0_i32_0 : i32, i32
  }
  func.func @transform_5(%arg0: i32) -> (i32, i32) {
    %c0_i32 = arith.constant 0 : i32
    %c0_i32_0 = arith.constant 0 : i32
    %c0_i32_1 = arith.constant 0 : i32
    return %c0_i32, %c0_i32_0 : i32, i32
  }
  func.func @transform_6(%arg0: i32) -> (i32, i32) {
    %c0_i32 = arith.constant 0 : i32
    %c0_i32_0 = arith.constant 0 : i32
    %c0_i32_1 = arith.constant 0 : i32
    return %c0_i32, %c0_i32_0 : i32, i32
  }
  func.func @transform_7(%arg0: i32) -> (i32, i32) {
    %c0_i32 = arith.constant 0 : i32
    %c0_i32_0 = arith.constant 0 : i32
    return %arg0, %c0_i32 : i32, i32
  }
}

</mosaic_0001>

<bundles_post_ra>
// kernel: nn_classifier_forward.1
= control target key start
LH: loop header
LB: loop body
LE: loop exit
PB: predicated region body
PF: predicated region fallthrough
CT: control target
= control target key end

     0   :  { %s747_s24 = smov 0   ;;  %s831_s0 = inlined_call_operand.vmem [shape: f32[64,16], index: 0, kind: input, shape index: {}]   ;;  %s832_s1 = inlined_call_operand.vmem [shape: bf16[16,128], index: 1, kind: input, shape index: {}]   ;;  %s833_s2 = inlined_call_operand.vmem [shape: f32[1,128], index: 2, kind: input, shape index: {}]   ;;  %s834_s3 = inlined_call_operand.vmem [shape: bf16[128,128], index: 3, kind: input, shape index: {}]   ;;  %s835_s4 = inlined_call_operand.vmem [shape: f32[1,128], index: 4, kind: input, shape index: {}]   ;;  %s836_s5 = inlined_call_operand.vmem [shape: bf16[128,8], index: 5, kind: input, shape index: {}]   ;;  %s837_s6 = inlined_call_operand.vmem [shape: f32[1,8], index: 6, kind: input, shape index: {}]   ;;  %s838_s7 = inlined_call_operand.vmem [shape: f32[64,8], index: 7, kind: output, shape index: {}]  }
   0x1 LB: > { %s574_s25 = sadd.s32 4294967295, %s705_s24   ;;  %p578_p0 = scmp.ge.s32.totalorder %s705_s24, 1  ;;  %s705_s24 = sphi %s747_s24, %s17_s24  }
   0x2   : > { %p238_p1 = scmp.lt.s32.totalorder %s705_s24, 3 }
   0x4   : > { %p239_p2 = pnand %p578_p0, %p238_p1 }
   0x5   : > { %s579_s28 = sshll.u32 (!%p239_p2), %s574_s25, 2 }
   0x6   : > { %242 = sbr.rel (%p239_p2) target bundleno = 462 (0x1ce), region = 48  ;;  %p271_p3 = scmp.lt.s32.totalorder (!%p239_p2), %s579_s28, 7 }
   0xb   : > { %v655_v0 = vld [vmem:[%s832_s1] sm:$0xff]  ;;  %v663_v1 = vld [vmem:[%s834_s3 + $0x38] sm:$0xff]  ;;  %v662_v2 = vld [vmem:[%s834_s3 + $0x30] sm:$0xff]  ;;  %s840_s28 = smov (!%p271_p3, %s579_s28), 7  ;;  %vm303_vm0 = vcmask 130048   ;;  %vm513_vm1 = vcmask 64512  }
   0xc   : > { %317 = vmatpush.bf16.msra.mxu0 %v655_v0  ;;  %402 = vmatpush.bf16.msra.mxu1 %v663_v1  ;;  %s580_s10 = sshll.u32 %s840_s28, 3  ;;  %v661_v3 = vld [vmem:[%s834_s3 + $0x28] sm:$0xff]  ;;  %v660_v7 = vld [vmem:[%s834_s3 + $0x20] sm:$0xff]  ;;  %v659_v11 = vld [vmem:[%s834_s3 + $0x18] sm:$0xff] }
   0xd   : > { %672 = vmatpush.bf16.msra.mxu3 %v663_v1  ;;  %s274_s13 = scalar_lea.vmem %s831_s0, %s580_s10  ;;  %v658_v12 = vld [vmem:[%s834_s3 + $0x10] sm:$0xff]  ;;  %v657_v13 = vld [vmem:[%s834_s3 + $0x8] sm:$0xff]  ;;  %v656_v14 = vld [vmem:[%s834_s3] sm:$0xff]  ;;  %s280_s9 = scalar_lea.vmem %s838_s7, %s580_s10 }
   0xe   : > { %v286_v4 = vld [vmem:[%s274_s13] sm:$0xff]  ;;  %v287_v5 = vld [vmem:[%s274_s13 + $0x8] sm:$0xff]  ;;  %v288_v8 = vld [vmem:[%s274_s13 + $0x10] sm:$0xff] }
   0xf   : > { %v290_v6 = vpack.c.bf16 %v287_v5, %v286_v4  ;;  %v289_v9 = vld [vmem:[%s274_s13 + $0x18] sm:$0xff]  ;;  %v670_v17 = vld [vmem:[%s836_s5 + $0x30] sm:$0xff]  ;;  %v696_v18 = vld [vmem:[%s833_s2] ss:$0 sm:$0xff] }
  0x10   : > { %403 = vmatpush.bf16.msra.mxu1 %v662_v2  ;;  %v291_v10 = vpack.c.bf16 %v289_v9, %v288_v8  ;;  %v671_v15 = vld [vmem:[%s836_s5 + $0x38] sm:$0xff]  ;;  %v669_v19 = vld [vmem:[%s836_s5 + $0x28] sm:$0xff]  ;;  %v668_v23 = vld [vmem:[%s836_s5 + $0x20] sm:$0xff] }
  0x11   : > { %673 = vmatpush.bf16.msra.mxu3 %v662_v2  ;;  %587 = vmatmul.msk.bf16.vlgmr.msra.gmra.mxu0 %vm303_vm0, %v290_v6  ;;  %v667_v34 = vld [vmem:[%s836_s5 + $0x18] sm:$0xff]  ;;  %v666_v35 = vld [vmem:[%s836_s5 + $0x10] sm:$0xff]  ;;  %v665_v36 = vld [vmem:[%s836_s5 + $0x8] sm:$0xff] }
  0x12   : > { %494 = vmatpush.bf16.msrb.mxu0 %v671_v15  ;;  %680 = vmatpush.bf16.msra.mxu2 %v671_v15  ;;  %v664_v37 = vld [vmem:[%s836_s5] sm:$0xff] }
  0x13   : > { %v697_v39 = vld [vmem:[%s835_s4] ss:$0 sm:$0xff] }
  0x14   : > { %404 = vmatpush.bf16.msra.mxu1 %v661_v3  ;;  %v698_v53 = vld [vmem:[%s837_s6] ss:$0 sm:$0xff] }
  0x15   : > { %674 = vmatpush.bf16.msra.mxu3 %v661_v3 }
  0x16   : > { %495 = vmatpush.bf16.msrb.mxu0 %v670_v17  ;;  %681 = vmatpush.bf16.msra.mxu2 %v670_v17 }
  0x18   : > { %405 = vmatpush.bf16.msra.mxu1 %v660_v7 }
  0x19   : > { %675 = vmatpush.bf16.msra.mxu3 %v660_v7 }
  0x1a   : > { %496 = vmatpush.bf16.msrb.mxu0 %v669_v19  ;;  %682 = vmatpush.bf16.msra.mxu2 %v669_v19 }
  0x1c   : > { %406 = vmatpush.bf16.msra.mxu1 %v659_v11 }
  0x1d   : > { %676 = vmatpush.bf16.msra.mxu3 %v659_v11 }
  0x1e   : > { %497 = vmatpush.bf16.msrb.mxu0 %v668_v23  ;;  %683 = vmatpush.bf16.msra.mxu2 %v668_v23 }
  0x20   : > { %407 = vmatpush.bf16.msra.mxu1 %v658_v12 }
  0x21   : > { %588 = vmatmul.msk.bf16.gmra.mxu0 %vm303_vm0, %v291_v10  ;;  %677 = vmatpush.bf16.msra.mxu3 %v658_v12 }
  0x22   : > { %498 = vmatpush.bf16.msrb.mxu0 %v667_v34  ;;  %684 = vmatpush.bf16.msra.mxu2 %v667_v34 }
  0x24   : > { %408 = vmatpush.bf16.msra.mxu1 %v657_v13 }
  0x25   : > { %678 = vmatpush.bf16.msra.mxu3 %v657_v13 }
  0x26   : > { %499 = vmatpush.bf16.msrb.mxu0 %v666_v35  ;;  %685 = vmatpush.bf16.msra.mxu2 %v666_v35 }
  0x28   : > { %409 = vmatpush.bf16.msra.mxu1 %v656_v14 }
  0x29   : > { %679 = vmatpush.bf16.msra.mxu3 %v656_v14 }
  0x2a   : > { %500 = vmatpush.bf16.msrb.mxu0 %v665_v36  ;;  %686 = vmatpush.bf16.msra.mxu2 %v665_v36 }
  0x2e   : > { %501 = vmatpush.bf16.msrb.mxu0 %v664_v37  ;;  %687 = vmatpush.bf16.msra.mxu2 %v664_v37 }
  0x8e   : > { %v319_v16 = vpop.f32.mrf.mxu0 }
  0x8f   : > { %v320_v20 = vadd.f32 %v696_v18, %v319_v16 }
  0x91   : > { %v329_v24 = vmax.f32 %v320_v20, 0.0 }
  0x96   : > { %v321_v21 = vpop.f32.mrf.mxu0 }
  0x97   : > { %v322_v22 = vadd.f32 %v696_v18, %v321_v21 }
  0x99   : > { %v330_v25 = vmax.f32 %v322_v22, 0.0 }
  0x9b   : > { %v333_v26 = vpack.c.bf16 %v330_v25, %v329_v24 }
  0x9d   : > { %410 = vmatmul.bf16.vlgmr.msra.gmra.mxu1 %v333_v26 }
  0x9e   : > { %v324_v27 = vpop.f32.mrf.mxu0 }
  0x9f   : > { %v325_v28 = vadd.f32 %v696_v18, %v324_v27 }
  0xa1   : > { %v331_v31 = vmax.f32 %v325_v28, 0.0 }
  0xa6   : > { %v326_v29 = vpop.f32.mrf.mxu0 }
  0xa7   : > { %v327_v30 = vadd.f32 %v696_v18, %v326_v29 }
  0xa9   : > { %v332_v32 = vmax.f32 %v327_v30, 0.0 }
  0xab   : > { %v334_v33 = vpack.c.bf16 %v332_v32, %v331_v31 }
  0xad   : > { %415 = vmatmul.bf16.vlgmr.msra.gmra.mxu3 %v334_v33 }
 0x11a   : > { %v411_v38 = vpop.f32.mrf.mxu1 }
 0x11b   : > { %v412_v40 = vadd.f32 %v697_v39, %v411_v38 }
 0x11d   : > { %v421_v43 = vmax.f32 %v412_v40, 0.0 }
 0x122   : > { %v413_v41 = vpop.f32.mrf.mxu1 }
 0x123   : > { %v414_v42 = vadd.f32 %v697_v39, %v413_v41 }
 0x125   : > { %v422_v44 = vmax.f32 %v414_v42, 0.0 }
 0x127   : > { %v425_v45 = vpack.c.bf16 %v422_v44, %v421_v43 }
 0x129   : > { %502 = vmatmul.bf16.vlgmr.msrb.gmra.mxu0 %v425_v45 }
 0x130   : > { %v416_v46 = vpop.f32.mrf.mxu3 }
 0x131   : > { %v417_v47 = vadd.f32 %v697_v39, %v416_v46 }
 0x133   : > { %v423_v50 = vmax.f32 %v417_v47, 0.0 }
 0x138   : > { %v418_v48 = vpop.f32.mrf.mxu3 }
 0x139   : > { %v419_v49 = vadd.f32 %v697_v39, %v418_v48 }
 0x13b   : > { %v424_v51 = vmax.f32 %v419_v49, 0.0 }
 0x13d   : > { %v426_v52 = vpack.c.bf16 %v424_v51, %v423_v50 }
 0x13f   : > { %507 = vmatmul.bf16.vlgmr.msra.gmra.mxu2 %v426_v52 }
 0x1a6   : > { %v503_v54 = vpop.f32.mrf.mxu0 }
 0x1a7   : > { %v504_v55 = vadd.f32 %v698_v53, %v503_v54 }
 0x1a9   : > { %514 = vst.msk [vmem:[%s280_s9] sm:$0xff] %vm513_vm1, %v504_v55 }
 0x1ae   : > { %v505_v56 = vpop.f32.mrf.mxu0 }
 0x1af   : > { %v506_v57 = vadd.f32 %v698_v53, %v505_v56 }
 0x1b1   : > { %515 = vst.msk [vmem:[%s280_s9 + $0x8] sm:$0xff] %vm513_vm1, %v506_v57 }
 0x1c2   : > { %v508_v58 = vpop.f32.mrf.mxu2 }
 0x1c3   : > { %v509_v59 = vadd.f32 %v698_v53, %v508_v58 }
 0x1c5   : > { %516 = vst.msk [vmem:[%s280_s9 + $0x10] sm:$0xff] %vm513_vm1, %v509_v59 }
 0x1ca   : > { %v510_v60 = vpop.f32.mrf.mxu2 }
 0x1cb   : > { %v511_v61 = vadd.f32 %v698_v53, %v510_v60 }
 0x1cd   : > { %517 = vst.msk [vmem:[%s280_s9 + $0x18] sm:$0xff] %vm513_vm1, %v511_v61 }
 0x1ce PF: > { %s17_s24 = sadd.s32 1, %s705_s24  }
 0x1cf   : > { %p14_p4 = scmp.ge.s32.totalorder %s17_s24, 4  }
 0x1d1   :  { %16 = sbr.rel (!%p14_p4) target bundleno = 1 (0x1), region = 78 }

</bundles_post_ra>
